<compile_context>
chip_gen: v5e
topology: v5e:2x2
jax: 0.10.0
libtpu: 0.0.40
codegen_flags: <defaults>
</compile_context>

<pallas_src>
import functools
import math

import jax
import jax.numpy as jnp
from jax.experimental import pallas as pl
from jax.experimental.pallas import tpu as pltpu


def _round_up(x, m):
    return ((x + m - 1) // m) * m


# plain-JAX mirror of the PyTorch gen_rel_dist_matrix (used by the reference only;
# the kernel regenerates the distance matrix in-kernel from iota).
def gen_rel_dist_matrix(seq_len, rel_range, use_negative):
    r = jnp.arange(seq_len)
    dist = r[None, :] - r[:, None]                     # dist[i, j] = j - i
    dist = jnp.clip(dist, -rel_range, rel_range)
    return dist + rel_range if use_negative else jnp.abs(dist)


_NT = (((1,), (1,)), ((), ()))   # A (m,k) x B (n,k) -> (m,n)   (contract last dims)
_NN = (((1,), (0,)), ((), ()))   # A (m,k) x B (k,n) -> (m,n)


# -----------------------------------------------------------------------------
# Tiled linear kernel:  y = x @ w^T + b   (w in PyTorch (N, K) layout, bf16 MXU)
# -----------------------------------------------------------------------------
def _linear_kernel(x_ref, w_ref, b_ref, o_ref, acc_ref):
    k = pl.program_id(2)

    @pl.when(k == 0)
    def _init():
        acc_ref[...] = jnp.zeros_like(acc_ref)

    # bf16 operands, f32 accumulation on the MXU.
    acc_ref[...] += jax.lax.dot_general(
        x_ref[...], w_ref[...], _NT, preferred_element_type=jnp.float32)

    @pl.when(k == pl.num_programs(2) - 1)
    def _fin():
        o_ref[...] = (acc_ref[...] + b_ref[...]).astype(o_ref.dtype)


def linear_pallas(x2d, w, b, *, out_dtype=jnp.float32, tm=512, tn=512, tk=1024):
    """y = x2d @ w.T + b ; x2d (M, K), w (N, K) [PyTorch layout], b (N,)."""
    M, K = x2d.shape
    N = w.shape[0]

    bm = M if M <= tm else tm          # full dim (always allowed) or aligned tile
    bn = N if N <= tn else tn
    bk = K if K <= tk else tk
    Mp, Np, Kp = _round_up(M, bm), _round_up(N, bn), _round_up(K, bk)

    xp = x2d.astype(jnp.bfloat16)
    wp = w.astype(jnp.bfloat16)
    if Mp != M or Kp != K:
        xp = jnp.pad(xp, ((0, Mp - M), (0, Kp - K)))
    if Np != N or Kp != K:
        wp = jnp.pad(wp, ((0, Np - N), (0, Kp - K)))
    bp = b if Np == N else jnp.pad(b, (0, Np - N))
    b2 = bp.astype(jnp.float32).reshape(1, Np)

    out = pl.pallas_call(
        _linear_kernel,
        out_shape=jax.ShapeDtypeStruct((Mp, Np), out_dtype),
        grid=(Mp // bm, Np // bn, Kp // bk),
        in_specs=[
            pl.BlockSpec((bm, bk), lambda i, j, k: (i, k)),
            pl.BlockSpec((bn, bk), lambda i, j, k: (j, k)),
            pl.BlockSpec((1, bn), lambda i, j, k: (0, j)),
        ],
        out_specs=pl.BlockSpec((bm, bn), lambda i, j, k: (i, j)),
        scratch_shapes=[pltpu.VMEM((bm, bn), jnp.float32)],
        compiler_params=pltpu.CompilerParams(
            dimension_semantics=("parallel", "parallel", "arbitrary"),
            vmem_limit_bytes=48 * 1024 * 1024),
    )(xp, wp, b2)

    if Mp != M or Np != N:
        out = out[:M, :N]
    return out


# -----------------------------------------------------------------------------
# Attention kernels: grid = (batch, head, query-tile), full-S keys per step
# -----------------------------------------------------------------------------
def _attn_rel_kernel(q_ref, k_ref, v_ref, mask_ref, ek_ref, ev_ref, o_ref, *,
                     scale, rel_range, use_negative, vocab):
    tq = q_ref.shape[2]
    skv = k_ref.shape[2]
    qi = pl.program_id(2)

    qh = q_ref[0, 0]                       # (tq,  hd) bf16
    kh = k_ref[0, 0]                       # (skv, hd) bf16
    vh = v_ref[0, 0]                       # (skv, hd) bf16

    # content scores on the MXU (bf16 operands, f32 accumulation), scale + mask
    scores = jax.lax.dot_general(qh, kh, _NT, preferred_element_type=jnp.float32)
    scores = scores * scale + mask_ref[0].astype(jnp.float32)

    # factorized relative key bias: ph = (q / sqrt(hd)) @ emb_k^T   (tq, vocab)
    ph = jax.lax.dot_general(qh, ek_ref[...], _NT,
                             preferred_element_type=jnp.float32) * scale

    # relative-distance ids regenerated in-kernel (Toeplitz in j - i): no HBM input
    rows = qi * tq + jax.lax.broadcasted_iota(jnp.int32, (tq, skv), 0)
    cols = jax.lax.broadcasted_iota(jnp.int32, (tq, skv), 1)
    dist = jnp.clip(cols - rows, -rel_range, rel_range)
    dist = dist + rel_range if use_negative else jnp.abs(dist)

    # scatter ph over the distance bands; indicators generated one at a time so
    # only one (tq, skv) plane is ever live.
    for r in range(vocab):
        scores = scores + jnp.where(dist == r, ph[:, r:r + 1], 0.0)

    # f32 softmax; denominator reciprocal goes to the (otherwise idle) EUP slot.
    m = jnp.max(scores, axis=-1, keepdims=True)
    e = jnp.exp(scores - m)
    attn = e * pl.reciprocal(jnp.sum(e, axis=-1, keepdims=True), approx=True)

    # context (MXU, bf16 operands) + factorized relative value bias via
    # outer-product accumulation (no 1-lane concatenates / masked lane writes).
    ctx = jax.lax.dot_general(attn.astype(jnp.bfloat16), vh, _NN,
                              preferred_element_type=jnp.float32)      # (tq, hd)
    ev = ev_ref[...].astype(jnp.float32)                               # (vocab, hd)
    for r in range(vocab):
        w_r = jnp.sum(jnp.where(dist == r, attn, 0.0), axis=-1, keepdims=True)
        ctx = ctx + w_r * ev[r:r + 1, :]

    o_ref[0, 0] = ctx.astype(o_ref.dtype)


def _attn_norel_kernel(q_ref, k_ref, v_ref, mask_ref, o_ref, *, scale):
    qh = q_ref[0, 0]
    kh = k_ref[0, 0]
    vh = v_ref[0, 0]
    scores = jax.lax.dot_general(qh, kh, _NT, preferred_element_type=jnp.float32)
    scores = scores * scale + mask_ref[0].astype(jnp.float32)
    m = jnp.max(scores, axis=-1, keepdims=True)
    e = jnp.exp(scores - m)
    attn = e * pl.reciprocal(jnp.sum(e, axis=-1, keepdims=True), approx=True)
    ctx = jax.lax.dot_general(attn.astype(jnp.bfloat16), vh, _NN,
                              preferred_element_type=jnp.float32)
    o_ref[0, 0] = ctx.astype(o_ref.dtype)


def attention_pallas(q, k, v, mask_bias, emb_k, emb_v, *, scale, rel_range,
                     use_negative):
    """q/k/v: (B, H, S_pad, hd) bf16; mask_bias: (B, S_pad, S_pad) bf16 additive."""
    B, H, S_pad, hd = q.shape
    tq = S_pad if S_pad <= 256 else 256
    grid = (B, H, S_pad // tq)

    q_spec = pl.BlockSpec((1, 1, tq, hd), lambda b, h, qi: (b, h, qi, 0))
    kv_spec = pl.BlockSpec((1, 1, S_pad, hd), lambda b, h, qi: (b, h, 0, 0))
    mask_spec = pl.BlockSpec((1, tq, S_pad), lambda b, h, qi: (b, qi, 0))
    out_spec = pl.BlockSpec((1, 1, tq, hd), lambda b, h, qi: (b, h, qi, 0))

    if rel_range > 0:
        vocab = emb_k.shape[0]
        kernel = functools.partial(_attn_rel_kernel, scale=scale,
                                   rel_range=rel_range,
                                   use_negative=use_negative, vocab=vocab)
        in_specs = [q_spec, kv_spec, kv_spec, mask_spec,
                    pl.BlockSpec((vocab, hd), lambda b, h, qi: (0, 0)),
                    pl.BlockSpec((vocab, hd), lambda b, h, qi: (0, 0))]
        args = (q, k, v, mask_bias, emb_k, emb_v)
    else:
        kernel = functools.partial(_attn_norel_kernel, scale=scale)
        in_specs = [q_spec, kv_spec, kv_spec, mask_spec]
        args = (q, k, v, mask_bias)

    return pl.pallas_call(
        kernel,
        out_shape=jax.ShapeDtypeStruct((B, H, S_pad, hd), jnp.float32),
        grid=grid,
        in_specs=in_specs,
        out_specs=out_spec,
        compiler_params=pltpu.CompilerParams(
            dimension_semantics=("parallel", "parallel", "parallel"),
            vmem_limit_bytes=48 * 1024 * 1024),
    )(*args)


# -----------------------------------------------------------------------------
# full forward (Pallas kernels + thin XLA layout plumbing)
# -----------------------------------------------------------------------------
def mhsa_forward(params, x, mask, *, num_heads, rel_range, use_negative):
    B, S, dim = x.shape
    hd = dim // num_heads
    scale = 1.0 / math.sqrt(hd)

    # QKV projection: bf16 MXU operands, f32 accumulate, bf16 output (halves HBM).
    qkv = linear_pallas(x.reshape(B * S, dim), params["w_qkv"], params["b_qkv"],
                        out_dtype=jnp.bfloat16)
    # head-major, tile-aligned (B, H, S, hd) slabs -> per-(b, h) BlockSpec slices.
    qkv = qkv.reshape(B, S, 3, num_heads, hd).transpose(2, 0, 3, 1, 4)
    q, k, v = qkv[0], qkv[1], qkv[2]

    S_pad = _round_up(S, 8) if S <= 256 else _round_up(S, 256)
    if S_pad != S:
        pad4 = ((0, 0), (0, 0), (0, S_pad - S), (0, 0))
        q, k, v = jnp.pad(q, pad4), jnp.pad(k, pad4), jnp.pad(v, pad4)

    # additive mask bias in bf16 (half the HBM/VMEM of f32); padded keys masked.
    if mask is None:
        mask_bias = jnp.zeros((B, S, S), jnp.float32)
    else:
        mask_bias = jnp.where(mask, jnp.float32(-1e18), jnp.float32(0.0))
    if S_pad != S:
        mask_bias = jnp.pad(mask_bias, ((0, 0), (0, S_pad - S), (0, S_pad - S)),
                            constant_values=-1e18)
    mask_bias = mask_bias.astype(jnp.bfloat16)

    if rel_range > 0:
        emb_k = params["emb_k"].astype(jnp.bfloat16)
        emb_v = params["emb_v"].astype(jnp.bfloat16)
    else:
        emb_k = emb_v = None

    ctx = attention_pallas(q, k, v, mask_bias, emb_k, emb_v, scale=scale,
                           rel_range=rel_range, use_negative=use_negative)
    ctx = ctx[:, :, :S, :].transpose(0, 2, 1, 3).reshape(B * S, dim)

    # output projection (bf16 MXU operands, f32 output).
    out = linear_pallas(ctx, params["w_out"], params["b_out"],
                        out_dtype=jnp.float32)
    return out.reshape(B, S, dim)


# -----------------------------------------------------------------------------
# pure-JAX f32 reference (mirrors the PyTorch forward exactly)
# -----------------------------------------------------------------------------
def mhsa_reference(params, x, mask, *, num_heads, rel_range, use_negative):
    B, S, dim = x.shape
    hd = dim // num_heads
    qkv = x.reshape(B * S, dim) @ params["w_qkv"].T + params["b_qkv"]
    qkv = qkv.reshape(B, S, 3, num_heads, hd).transpose(2, 0, 3, 1, 4)
    q, k, v = qkv[0], qkv[1], qkv[2]
    q = q / math.sqrt(hd)
    scores = jnp.einsum("bhsd,bhtd->bhst", q, k)
    if rel_range > 0:
        rel_dist = gen_rel_dist_matrix(S, rel_range, use_negative)
        relk = params["emb_k"][rel_dist]
        relv = params["emb_v"][rel_dist]
        scores = scores + jnp.einsum("bhsd,std->bhst", q, relk)
    if mask is not None:
        scores = jnp.where(mask[:, None, :, :], -1e18, scores)
    attn = jax.nn.softmax(scores, axis=-1)
    ctx = jnp.einsum("bhst,bhtd->bhsd", attn, v)
    if rel_range > 0:
        ctx = ctx + jnp.einsum("bhst,std->bhsd", attn, relv)
    ctx = ctx.transpose(0, 2, 1, 3).reshape(B * S, dim)
    out = ctx @ params["w_out"].T + params["b_out"]
    return out.reshape(B, S, dim)


# -----------------------------------------------------------------------------
if __name__ == "__main__":
    B, S, dim, num_heads = 2, 8, 32, 4
    hd = dim // num_heads
    rel_range, use_negative = 4, True
    vocab = rel_range * 2 + 1 if use_negative else rel_range + 1

    key = jax.random.PRNGKey(0)
    ks = jax.random.split(key, 8)
    params = {
        "w_qkv": jax.random.normal(ks[0], (3 * dim, dim), jnp.float32) * 0.02,
        "b_qkv": jax.random.normal(ks[1], (3 * dim,), jnp.float32) * 0.02,
        "w_out": jax.random.normal(ks[2], (dim, dim), jnp.float32) * 0.02,
        "b_out": jax.random.normal(ks[3], (dim,), jnp.float32) * 0.02,
        "emb_k": jax.random.normal(ks[4], (vocab, hd), jnp.float32) * 0.02,
        "emb_v": jax.random.normal(ks[5], (vocab, hd), jnp.float32) * 0.02,
    }
    x = jax.random.normal(ks[6], (B, S, dim), jnp.float32)
    # causal boolean mask: True = masked (like PyTorch masked_fill)
    mask = jnp.triu(jnp.ones((S, S), dtype=bool), k=1)[None].repeat(B, axis=0)

    out = mhsa_forward(params, x, mask, num_heads=num_heads,
                       rel_range=rel_range, use_negative=use_negative)
    out = jax.block_until_ready(out)

    ref = mhsa_reference(params, x, mask, num_heads=num_heads,
                         rel_range=rel_range, use_negative=use_negative)
    assert out.shape == (B, S, dim)
    # bf16 MXU operands -> looser tolerance than the pure-f32 version.
    assert jnp.allclose(out, ref, atol=2e-2, rtol=2e-2), "mismatch vs reference"

    print("KERNEL_OK")
</pallas_src>

<mosaic_0001>
module attributes {stable_mosaic.version = 11 : i64} {
  func.func @_linear_kernel(%arg0: i32, %arg1: i32, %arg2: i32, %arg3: memref<16x32xbf16, #tpu.memory_space<vmem>>, %arg4: memref<96x32xbf16, #tpu.memory_space<vmem>>, %arg5: memref<1x96xf32, #tpu.memory_space<vmem>>, %arg6: memref<16x96xbf16, #tpu.memory_space<vmem>>, %arg7: memref<16x96xf32, #tpu.memory_space<vmem>>) attributes {dimension_semantics = [#tpu.dimension_semantics<parallel>, #tpu.dimension_semantics<parallel>, #tpu.dimension_semantics<arbitrary>], iteration_bounds = array<i64: 1, 1, 1>, scalar_prefetch = 0 : i64, scratch_operands = 1 : i64, tpu.core_type = #tpu.core_type<tc>, window_params = [{transform_indices = @transform_0, window_bounds = array<i64: 16, 32>}, {transform_indices = @transform_1, window_bounds = array<i64: 96, 32>}, {transform_indices = @transform_2, window_bounds = array<i64: 1, 96>}, {transform_indices = @transform_3, window_bounds = array<i64: 16, 96>}]} {
    %c0_i32 = arith.constant 0 : i32
    %0 = arith.cmpi eq, %arg2, %c0_i32 : i32
    %1 = arith.extui %0 : i1 to i32
    %c0_i32_0 = arith.constant 0 : i32
    %2 = arith.cmpi ne, %1, %c0_i32_0 : i32
    scf.if %2 {
      %cst_10 = arith.constant 0.000000e+00 : f32
      %12 = vector.broadcast %cst_10 : f32 to vector<16x96xf32>
      %c0_11 = arith.constant 0 : index
      %c0_12 = arith.constant 0 : index
      %13 = vector.load %arg7[%c0_11, %c0_12] : memref<16x96xf32, #tpu.memory_space<vmem>>, vector<16x96xf32>
      tpu.vector_store %arg7[%c0_11, %c0_12], %12 {strides = array<i32>} : memref<16x96xf32, #tpu.memory_space<vmem>>, vector<16x96xf32>,
    } else {
    }
    %c0 = arith.constant 0 : index
    %c0_1 = arith.constant 0 : index
    %3 = vector.load %arg7[%c0, %c0_1] : memref<16x96xf32, #tpu.memory_space<vmem>>, vector<16x96xf32>
    %c0_2 = arith.constant 0 : index
    %c0_3 = arith.constant 0 : index
    %4 = vector.load %arg3[%c0_2, %c0_3] : memref<16x32xbf16, #tpu.memory_space<vmem>>, vector<16x32xbf16>
    %c0_4 = arith.constant 0 : index
    %c0_5 = arith.constant 0 : index
    %5 = vector.load %arg4[%c0_4, %c0_5] : memref<96x32xbf16, #tpu.memory_space<vmem>>, vector<96x32xbf16>
    %cst = arith.constant dense<0.000000e+00> : vector<16x96xf32>
    %6 = tpu.matmul %4, %5, %cst {dimension_numbers = #tpu.dot_dimension_numbers<[1], [1], [0], [0], [0, 0, 1, 0], [], []>} : vector<16x32xbf16>, vector<96x32xbf16>, vector<16x96xf32> -> vector<16x96xf32>
    %7 = arith.addf %3, %6 : vector<16x96xf32>
    %c0_6 = arith.constant 0 : index
    %c0_7 = arith.constant 0 : index
    %8 = vector.load %arg7[%c0_6, %c0_7] : memref<16x96xf32, #tpu.memory_space<vmem>>, vector<16x96xf32>
    tpu.vector_store %arg7[%c0_6, %c0_7], %7 {strides = array<i32>} : memref<16x96xf32, #tpu.memory_space<vmem>>, vector<16x96xf32>,
    %c0_i32_8 = arith.constant 0 : i32
    %9 = arith.cmpi eq, %arg2, %c0_i32_8 : i32
    %10 = arith.extui %9 : i1 to i32
    %c0_i32_9 = arith.constant 0 : i32
    %11 = arith.cmpi ne, %10, %c0_i32_9 : i32
    scf.if %11 {
      %c0_10 = arith.constant 0 : index
      %c0_11 = arith.constant 0 : index
      %12 = vector.load %arg7[%c0_10, %c0_11] : memref<16x96xf32, #tpu.memory_space<vmem>>, vector<16x96xf32>
      %c0_12 = arith.constant 0 : index
      %c0_13 = arith.constant 0 : index
      %13 = vector.load %arg5[%c0_12, %c0_13] : memref<1x96xf32, #tpu.memory_space<vmem>>, vector<1x96xf32>
      %14 = vector.broadcast %13 : vector<1x96xf32> to vector<16x96xf32>
      %15 = arith.addf %12, %14 : vector<16x96xf32>
      %16 = arith.truncf %15 : vector<16x96xf32> to vector<16x96xbf16>
      %c0_14 = arith.constant 0 : index
      %c0_15 = arith.constant 0 : index
      %17 = vector.load %arg6[%c0_14, %c0_15] : memref<16x96xbf16, #tpu.memory_space<vmem>>, vector<16x96xbf16>
      tpu.vector_store %arg6[%c0_14, %c0_15], %16 {strides = array<i32>} : memref<16x96xbf16, #tpu.memory_space<vmem>>, vector<16x96xbf16>,
    } else {
    }
    return
  }
  func.func @transform_0(%arg0: i32, %arg1: i32, %arg2: i32) -> (i32, i32) {
    %c0_i32 = arith.constant 0 : i32
    return %arg0, %arg2 : i32, i32
  }
  func.func @transform_1(%arg0: i32, %arg1: i32, %arg2: i32) -> (i32, i32) {
    %c0_i32 = arith.constant 0 : i32
    return %arg1, %arg2 : i32, i32
  }
  func.func @transform_2(%arg0: i32, %arg1: i32, %arg2: i32) -> (i32, i32) {
    %c0_i32 = arith.constant 0 : i32
    %c0_i32_0 = arith.constant 0 : i32
    return %c0_i32, %arg1 : i32, i32
  }
  func.func @transform_3(%arg0: i32, %arg1: i32, %arg2: i32) -> (i32, i32) {
    %c0_i32 = arith.constant 0 : i32
    return %arg0, %arg1 : i32, i32
  }
}

</mosaic_0001>

<bundles_post_ra>
// kernel: tpu_custom_call.1
= control target key start
LH: loop header
LB: loop body
LE: loop exit
PB: predicated region body
PF: predicated region fallthrough
CT: control target
= control target key end

     0   :  { %vm74_vm0 = vcmask 261120   ;;  %s278_s0 = inlined_call_operand.vmem [shape: bf16[16,32], index: 0, kind: input, shape index: {}]   ;;  %s279_s1 = inlined_call_operand.vmem [shape: bf16[96,32], index: 1, kind: input, shape index: {}]   ;;  %s280_s2 = inlined_call_operand.vmem [shape: f32[1,96], index: 2, kind: input, shape index: {}]   ;;  %s281_s3 = inlined_call_operand.hbm [shape: bf16[16,96], index: 3, kind: output, shape index: {}]  }
   0x1   :  { %v184_v0 = vld [vmem:[%s279_s1 + $0x28] sm:$0xff] }
   0x2   :  { %8 = vsyncpa [#allocation4], 0  ;;  %v94_v1 = vsel %vm74_vm0, %v184_v0, 0  ;;  %v183_v2 = vld [vmem:[%s279_s1 + $0x20] sm:$0xff]  ;;  %v182_v4 = vld [vmem:[%s279_s1 + $0x18] sm:$0xff]  ;;  %vm20_vm1 = vcmask 785408  }
   0x3   :  { %98 = vmatpush.bf16.xpose.msra.mxu0 %v94_v1  ;;  %v91_v3 = vsel %vm74_vm0, %v183_v2, 0  ;;  %v88_v5 = vsel %vm74_vm0, %v182_v4, 0  ;;  %v216_v6 = vmov 0.0   ;;  %v181_v7 = vld [vmem:[%s279_s1 + $0x10] sm:$0xff]  ;;  %v180_v9 = vld [vmem:[%s279_s1 + $0x8] sm:$0xff]  ;;  %v179_v11 = vld [vmem:[%s279_s1] sm:$0xff] }
   0x4   :  { %21 = vst.msk [vmem:[#allocation2] sm:$0xff] %vm20_vm1, %v216_v6  ;;  %v85_v8 = vsel %vm74_vm0, %v181_v7, 0  ;;  %v82_v10 = vsel %vm74_vm0, %v180_v9, 0  ;;  %v79_v12 = vsel %vm74_vm0, %v179_v11, 0  ;;  %v178_v13 = vld [vmem:[%s278_s0] sm:$0xff]  ;;  %vm128_vm2 = vcmask 781312  }
   0x5   :  { %22 = vst.msk [vmem:[#allocation2 + $0x8] sm:$0xff] %vm20_vm1, %v216_v6  ;;  %v189_v18 = vld [vmem:[%s280_s2] ss:$0 sm:$0xff]  ;;  %s217_s0 = smov [#allocation3]   ;;  %s137_s30 = sshll.u32 %s281_s3, 4  ;;  %s138_s30 = int_to_ptr.hbm [resolvable:$true] %s137_s30 }
   0x6   :  { %s135_s1 = sshll.u32 %s217_s0, 4  ;;  %s218_s2 = smov 64   ;;  %s136_s1 = int_to_ptr.vmem [resolvable:$true] %s135_s1 }
   0x7   :  { %s219_s4 = smov 4  }
   0xb   :  { %99 = vmatpush.bf16.xpose.msra.mxu0 %v91_v3  ;;  %v23_v14 = vld [vmem:[#allocation2] sm:$0xff] }
   0xc   :  { %v24_v17 = vld [vmem:[#allocation2 + $0x8] sm:$0xff] }
  0x13   :  { %100 = vmatpush.bf16.xpose.msra.mxu0 %v88_v5 }
  0x1b   :  { %101 = vmatpush.bf16.xpose.msra.mxu0 %v85_v8 }
  0x23   :  { %102 = vmatpush.bf16.xpose.msra.mxu0 %v82_v10 }
  0x2b   :  { %103 = vmatpush.bf16.xpose.msra.mxu0 %v79_v12 }
  0x32   :  { %177 = vmatmul.msk.bf16.vlgmr.msra.gmra.mxu0 %vm74_vm0, %v178_v13 }
  0xaf   :  { %v105_v15 = vpop.f32.mrf.mxu0 }
  0xb0   :  { %v110_v16 = vadd.f32 %v105_v15, %v23_v14 }
  0xb2   :  { %113 = vst.msk [vmem:[#allocation2] sm:$0xff] %vm20_vm1, %v110_v16 }
  0xb7   :  { %v107_v19 = vpop.f32.mrf.mxu0 }
  0xb8   :  { %v111_v20 = vadd.f32 %v107_v19, %v24_v17 }
  0xb9   :  { %v118_v21 = vld [vmem:[#allocation2] sm:$0xff] }
  0xba   :  { %114 = vst.msk [vmem:[#allocation2 + $0x8] sm:$0xff] %vm20_vm1, %v111_v20  ;;  %v124_v22 = vadd.f32 %v189_v18, %v118_v21 }
  0xbc   :  { %v126_v23 = vpack.c.bf16 %v124_v22, %v124_v22 }
  0xbe   :  { %129 = vst.msk [vmem:[#allocation3] sm:$0xf] %vm128_vm2, %v126_v23 }
  0xc1   :  { %v119_v24 = vld [vmem:[#allocation2 + $0x8] sm:$0xff] }
  0xc2   :  { %v125_v25 = vadd.f32 %v189_v18, %v119_v24 }
  0xc4   :  { %v127_v26 = vpack.c.bf16 %v125_v25, %v125_v25 }
  0xc6   :  { %130 = vst.msk [vmem:[#allocation3 + $0x4] sm:$0xf] %vm128_vm2, %v127_v26 }
  0xc7   :  { %143 = dma.vmem_to_hbm [thread:$0]  %s136_s1, 128, %s138_s30, [#allocation4], %s218_s2, %s218_s2, %s219_s4  }
  0xc8   :  { %214 = dma.done.wait [#allocation4], 128  }
  0xc9   :  { %215 = vsyncadd [#allocation4], 4294967168 }
  0xca   :  { %148 = vsyncpa [#allocation4], 1 }

</bundles_post_ra>
